<compile_context>
chip_gen: v5e
topology: v5e:2x2
jax: 0.10.0
libtpu: 0.0.40
codegen_flags: <defaults>
</compile_context>

<pallas_src>
import functools

import numpy as np

import jax
import jax.numpy as jnp
from jax.experimental import pallas as pl
from jax.experimental.pallas import tpu as pltpu


def _bicubic_matrix(in_size: int, out_size: int) -> jnp.ndarray:
    """Dense (out_size, in_size) interpolation matrix matching PyTorch's
    bicubic upsampling with align_corners=True (cubic coefficient A=-0.75)."""
    A = -0.75

    if out_size > 1:
        src = jnp.arange(out_size, dtype=jnp.float32) * (
            (in_size - 1) / (out_size - 1)
        )
    else:
        src = jnp.zeros((out_size,), dtype=jnp.float32)

    f = jnp.floor(src)
    t = src - f  # fractional part in [0, 1)

    def cubic1(x):  # |x| <= 1
        return ((A + 2.0) * x - (A + 3.0)) * x * x + 1.0

    def cubic2(x):  # 1 < |x| < 2
        return ((A * x - 5.0 * A) * x + 8.0 * A) * x - 4.0 * A

    c0 = cubic2(t + 1.0)
    c1 = cubic1(t)
    c2 = cubic1(1.0 - t)
    c3 = cubic2(2.0 - t)
    coeffs = jnp.stack([c0, c1, c2, c3], axis=1)  # (out, 4)

    idx = f.astype(jnp.int32)[:, None] + jnp.arange(-1, 3, dtype=jnp.int32)[None, :]
    idx = jnp.clip(idx, 0, in_size - 1)  # border clamp (duplicate taps get summed)

    rows = jnp.broadcast_to(
        jnp.arange(out_size, dtype=jnp.int32)[:, None], idx.shape
    )
    # Scatter-add build: O(out*in) memory, no (out, 4, in) one_hot intermediate.
    Wm = jnp.zeros((out_size, in_size), jnp.float32).at[rows, idx].add(coeffs)
    return Wm


def _choose_planes_per_block(P, H, W, H_out, W_out, itemsize):
    """Pick B = number of (n,c) planes folded into one grid step."""
    in_bytes = H * W * itemsize
    out_bytes = H_out * W_out * itemsize
    inter_bytes = (H * W_out + H_out * W_out) * 4  # f32 intermediates per plane
    per_plane = 2 * in_bytes + 2 * out_bytes + inter_bytes  # double-buffered I/O
    weight_bytes = (H_out * H + W * W_out) * 4
    budget = 24 * 1024 * 1024 - weight_bytes  # conservative across v5e/v6e/v7x

    cap = max(1, budget // per_plane)
    if P >= 2:
        cap = min(cap, (P + 1) // 2)  # keep grid >= 2 so both v7x TCs get work
    cap = min(cap, P)
    cap = min(cap, max(1, 4096 // max(W_out, 1)))  # bound out-block lane width
    cap = min(cap, max(1, 4096 // max(H, 1)))      # bound in-block sublane rows
    cap = max(int(cap), 1)

    # Prefer a B making the output block's last dim a multiple of 128 (dense vst).
    for cand in range(cap, 0, -1):
        if (cand * W_out) % 128 == 0:
            return cand
    return cap


def _bicubic_kernel(wh_ref, wwt_ref, x_ref, o_ref, *, planes, h_in):
    # wh_ref:  (H_out, H)
    # wwt_ref: (W, W_out)
    # x_ref:   (1, planes*H, W)        -- `planes` (n,c) planes, sublane-stacked
    # o_ref:   (1, H_out, planes*W_out) -- planes lane-stacked (lane-dense block)
    x = x_ref[0].astype(jnp.float32)  # (B*H, W)

    # Width pass: one matmul over all planes at once.
    t1 = jnp.dot(x, wwt_ref[...], preferred_element_type=jnp.float32)  # (B*H, W_out)

    # Rearrange per-plane strips from sublane-stacked to lane-stacked so the
    # height pass is a single dense matmul with a >=128-lane result.
    if planes > 1:
        strips = [t1[b * h_in:(b + 1) * h_in, :] for b in range(planes)]
        t2 = jnp.concatenate(strips, axis=1)  # (H, B*W_out)
    else:
        t2 = t1  # (H, W_out)

    # Height pass.
    out = jnp.dot(wh_ref[...], t2, preferred_element_type=jnp.float32)  # (H_out, B*W_out)
    o_ref[0] = out.astype(o_ref.dtype)


@functools.partial(jax.jit, static_argnames=("upscale",))
def bicubic_up(x: jnp.ndarray, upscale: int) -> jnp.ndarray:
    """x: (N, C, H, W) float array. Returns (N, C, H*upscale, W*upscale)."""
    N, C, H, W = x.shape
    H_out = int(H * upscale)
    W_out = int(W * upscale)
    P = N * C

    wh = _bicubic_matrix(H, H_out)        # (H_out, H)
    wwt = _bicubic_matrix(W, W_out).T     # (W, W_out)

    itemsize = jnp.dtype(x.dtype).itemsize
    B = _choose_planes_per_block(P, H, W, H_out, W_out, itemsize)
    G = -(-P // B)          # grid length (>= 2 whenever P >= 2)
    P_pad = G * B

    x_planes = x.reshape(P, H, W)
    if P_pad != P:
        x_planes = jnp.pad(x_planes, ((0, P_pad - P), (0, 0), (0, 0)))
    # Pure reshape (no transpose): planes stacked along sublanes of each block.
    x_blocks = x_planes.reshape(G, B * H, W)

    kernel = functools.partial(_bicubic_kernel, planes=B, h_in=H)

    out_blocks = pl.pallas_call(
        kernel,
        out_shape=jax.ShapeDtypeStruct((G, H_out, B * W_out), x.dtype),
        grid_spec=pltpu.PrefetchScalarGridSpec(
            num_scalar_prefetch=0,
            grid=(G,),
            in_specs=[
                pl.BlockSpec((H_out, H), lambda g: (0, 0)),        # Wh (resident)
                pl.BlockSpec((W, W_out), lambda g: (0, 0)),        # Ww^T (resident)
                pl.BlockSpec((1, B * H, W), lambda g: (g, 0, 0)),  # B planes / step
            ],
            out_specs=pl.BlockSpec((1, H_out, B * W_out), lambda g: (g, 0, 0)),
        ),
        compiler_params=pltpu.CompilerParams(
            dimension_semantics=("parallel",),
            vmem_limit_bytes=48 * 1024 * 1024,
        ),
    )(wh, wwt, x_blocks)

    # Un-fold the lane-stacked planes back to NCHW (layout plumbing outside the
    # kernel, done once by XLA).
    out = out_blocks.reshape(G, H_out, B, W_out).transpose(0, 2, 1, 3)
    out = out.reshape(P_pad, H_out, W_out)[:P]
    return out.reshape(N, C, H_out, W_out)


if __name__ == "__main__":
    key = jax.random.PRNGKey(0)
    x = jax.random.normal(key, (2, 4, 16, 16), dtype=jnp.float32)

    upscale = 2
    out = bicubic_up(x, upscale)
    out = jax.block_until_ready(out)

    assert out.shape == (2, 4, 32, 32), out.shape
    assert out.dtype == x.dtype

    # Sanity: with align_corners=True, corner pixels are preserved exactly.
    assert jnp.allclose(out[:, :, 0, 0], x[:, :, 0, 0], atol=1e-5)
    assert jnp.allclose(out[:, :, -1, -1], x[:, :, -1, -1], atol=1e-5)

    # Full reference check (float64 on host); loose tolerance covers possible
    # bf16-pass MXU decomposition of f32 matmuls.
    wh_np = np.asarray(_bicubic_matrix(16, 32), dtype=np.float64)
    ww_np = np.asarray(_bicubic_matrix(16, 32), dtype=np.float64)
    ref = np.einsum("oh,nchw,pw->ncop", wh_np, np.asarray(x, np.float64), ww_np)
    np.testing.assert_allclose(np.asarray(out), ref, rtol=3e-2, atol=3e-2)

    print("KERNEL_OK")
</pallas_src>

<mosaic_0001>
module attributes {stable_mosaic.version = 11 : i64} {
  func.func @_bicubic_kernel(%arg0: i32, %arg1: memref<32x16xf32, #tpu.memory_space<vmem>>, %arg2: memref<16x32xf32, #tpu.memory_space<vmem>>, %arg3: memref<1x64x16xf32, #tpu.memory_space<vmem>>, %arg4: memref<1x32x128xf32, #tpu.memory_space<vmem>>) attributes {dimension_semantics = [#tpu.dimension_semantics<parallel>], iteration_bounds = array<i64: 2>, scalar_prefetch = 0 : i64, scratch_operands = 0 : i64, tpu.core_type = #tpu.core_type<tc>, window_params = [{pipeline_mode = #tpu.pipeline_mode<synchronous>, transform_indices = @transform_0, window_bounds = array<i64: 32, 16>}, {pipeline_mode = #tpu.pipeline_mode<synchronous>, transform_indices = @transform_1, window_bounds = array<i64: 16, 32>}, {transform_indices = @transform_2, window_bounds = array<i64: 1, 64, 16>}, {transform_indices = @transform_3, window_bounds = array<i64: 1, 32, 128>}]} {
    %c0 = arith.constant 0 : index
    %c0_0 = arith.constant 0 : index
    %c0_1 = arith.constant 0 : index
    %0 = vector.load %arg3[%c0, %c0_0, %c0_1] : memref<1x64x16xf32, #tpu.memory_space<vmem>>, vector<1x64x16xf32>
    %1 = vector.shape_cast %0 : vector<1x64x16xf32> to vector<64x16xf32>
    %c0_2 = arith.constant 0 : index
    %c0_3 = arith.constant 0 : index
    %2 = vector.load %arg2[%c0_2, %c0_3] : memref<16x32xf32, #tpu.memory_space<vmem>>, vector<16x32xf32>
    %cst = arith.constant dense<0.000000e+00> : vector<64x32xf32>
    %3 = tpu.matmul %1, %2, %cst {dimension_numbers = #tpu.dot_dimension_numbers<[1], [0], [0], [1], [0, 0, 1, 1], [], []>} : vector<64x16xf32>, vector<16x32xf32>, vector<64x32xf32> -> vector<64x32xf32>
    %4 = vector.extract_strided_slice %3 {offsets = [0, 0], sizes = [16, 32], strides = [1, 1]} : vector<64x32xf32> to vector<16x32xf32>
    %5 = vector.extract_strided_slice %3 {offsets = [16, 0], sizes = [16, 32], strides = [1, 1]} : vector<64x32xf32> to vector<16x32xf32>
    %6 = vector.extract_strided_slice %3 {offsets = [32, 0], sizes = [16, 32], strides = [1, 1]} : vector<64x32xf32> to vector<16x32xf32>
    %7 = vector.extract_strided_slice %3 {offsets = [48, 0], sizes = [16, 32], strides = [1, 1]} : vector<64x32xf32> to vector<16x32xf32>
    %8 = tpu.concatenate %4, %5, %6, %7 in 1 : vector<16x32xf32>, vector<16x32xf32>, vector<16x32xf32>, vector<16x32xf32> -> vector<16x128xf32>
    %c0_4 = arith.constant 0 : index
    %c0_5 = arith.constant 0 : index
    %9 = vector.load %arg1[%c0_4, %c0_5] : memref<32x16xf32, #tpu.memory_space<vmem>>, vector<32x16xf32>
    %cst_6 = arith.constant dense<0.000000e+00> : vector<32x128xf32>
    %10 = tpu.matmul %9, %8, %cst_6 {dimension_numbers = #tpu.dot_dimension_numbers<[1], [0], [0], [1], [0, 0, 1, 1], [], []>} : vector<32x16xf32>, vector<16x128xf32>, vector<32x128xf32> -> vector<32x128xf32>
    %c0_7 = arith.constant 0 : index
    %c0_8 = arith.constant 0 : index
    %c0_9 = arith.constant 0 : index
    %11 = vector.load %arg4[%c0_7, %c0_8, %c0_9] : memref<1x32x128xf32, #tpu.memory_space<vmem>>, vector<1x32x128xf32>
    %12 = vector.shape_cast %11 : vector<1x32x128xf32> to vector<32x128xf32>
    %13 = vector.shape_cast %10 : vector<32x128xf32> to vector<1x32x128xf32>
    tpu.vector_store %arg4[%c0_7, %c0_8, %c0_9], %13 {strides = array<i32>} : memref<1x32x128xf32, #tpu.memory_space<vmem>>, vector<1x32x128xf32>,
    return
  }
  func.func @transform_0(%arg0: i32) -> (i32, i32) {
    %c0_i32 = arith.constant 0 : i32
    %c0_i32_0 = arith.constant 0 : i32
    %c0_i32_1 = arith.constant 0 : i32
    return %c0_i32, %c0_i32_0 : i32, i32
  }
  func.func @transform_1(%arg0: i32) -> (i32, i32) {
    %c0_i32 = arith.constant 0 : i32
    %c0_i32_0 = arith.constant 0 : i32
    %c0_i32_1 = arith.constant 0 : i32
    return %c0_i32, %c0_i32_0 : i32, i32
  }
  func.func @transform_2(%arg0: i32) -> (i32, i32, i32) {
    %c0_i32 = arith.constant 0 : i32
    %c0_i32_0 = arith.constant 0 : i32
    %c0_i32_1 = arith.constant 0 : i32
    return %arg0, %c0_i32, %c0_i32_0 : i32, i32, i32
  }
  func.func @transform_3(%arg0: i32) -> (i32, i32, i32) {
    %c0_i32 = arith.constant 0 : i32
    %c0_i32_0 = arith.constant 0 : i32
    %c0_i32_1 = arith.constant 0 : i32
    return %arg0, %c0_i32, %c0_i32_0 : i32, i32, i32
  }
}

</mosaic_0001>

<bundles_post_ra>
// kernel: bicubic_up.1
= control target key start
LH: loop header
LB: loop body
LE: loop exit
PB: predicated region body
PF: predicated region fallthrough
CT: control target
= control target key end

     0   :  { %s472_s12 = smov 0   ;;  %s523_s0 = inlined_call_operand.vmem [shape: f32[32,16], index: 0, kind: input, shape index: {}]   ;;  %s524_s1 = inlined_call_operand.vmem [shape: f32[16,32], index: 1, kind: input, shape index: {}]   ;;  %s525_s2 = inlined_call_operand.vmem [shape: f32[2,64,16], index: 2, kind: input, shape index: {}]   ;;  %s526_s3 = inlined_call_operand.vmem [shape: f32[2,32,128], index: 3, kind: output, shape index: {}]  }
   0x1 LB: > { %s384_s13 = sadd.s32 4294967295, %s447_s12   ;;  %p388_p0 = scmp.ge.s32.totalorder %s447_s12, 1  ;;  %s447_s12 = sphi %s472_s12, %s13_s12  }
   0x2   : > { %p137_p1 = scmp.lt.s32.totalorder %s447_s12, 3 }
   0x4   : > { %p138_p2 = pnand %p388_p0, %p137_p1 }
   0x5   : > { %p161_p3 = scmp.lt.s32.totalorder (!%p138_p2), %s384_s13, 1  ;;  %s449_s22 = smov (!%p138_p2), 96  }
   0x6   : > { %141 = sbr.rel (%p138_p2) target bundleno = 432 (0x1b0), region = 32  ;;  %s450_s23 = smov (!%p138_p2), 32  }
   0x7   : > { %s451_s24 = smov (!%p138_p2), 64  }
   0xb   : > { %v180_v0 = vld [vmem:[%s524_s1 + $0x8] sm:$0xff]  ;;  %v179_v1 = vld [vmem:[%s524_s1] sm:$0xff]  ;;  %s528_s13 = smov (!%p161_p3, %s384_s13), 1  ;;  %vm181_vm0 = vcmask 130048   ;;  %vm271_vm1 = vcmask 261120   ;;  %vm274_vm2 = vcmask 523264  }
   0xc   : > { %220 = vmatpush.msra.mxu0 %v180_v0  ;;  %409 = vmatpush.msra.mxu2 %v180_v0  ;;  %s407_s18 = sshll.u32 %s528_s13, 6  ;;  %vm277_vm3 = vcmask 785408   ;;  %v280_v35 = vld [vmem:[%s523_s0] sm:$0xff]  ;;  %v283_v36 = vld [vmem:[%s523_s0 + $0x18] sm:$0xff]  ;;  %v281_v38 = vld [vmem:[%s523_s0 + $0x8] sm:$0xff]  ;;  %s408_s6 = sshll.u32 %s528_s13, 5 }
   0xd   : > { %410 = vmatpush.msra.mxu3 %v180_v0  ;;  %s165_s21 = scalar_lea.vmem %s525_s2, %s407_s18  ;;  %v282_v39 = vld [vmem:[%s523_s0 + $0x10] sm:$0xff]  ;;  %s170_s9 = scalar_lea.vmem %s526_s3, %s408_s6 }
   0xe   : > { %221 = vmatpush.msra.mxu0 %v179_v1  ;;  %411 = vmatpush.msra.mxu2 %v179_v1  ;;  %v171_v2 = vld [vmem:[%s165_s21] sm:$0xff]  ;;  %v174_v3 = vld [vmem:[%s165_s21 + $0x18] sm:$0xff]  ;;  %v177_v4 = vld [vmem:[%s165_s21 + $0x30] sm:$0xff] }
   0xf   : > { %412 = vmatpush.msra.mxu3 %v179_v1  ;;  %393 = vmatmul.msk.f32.vlgmr.msra.gmra.mxu0 %vm181_vm0, %v171_v2  ;;  %v172_v5 = vld [vmem:[%s165_s21 + $0x8] sm:$0xff]  ;;  %v175_v6 = vld [vmem:[%s165_s21 + $0x20] sm:$0xff]  ;;  %v178_v7 = vld [vmem:[%s165_s21 + $0x38] sm:$0xff] }
  0x10   : > { %396 = vmatmul.msk.f32.vlgmr.msra.gmra.mxu2 %vm181_vm0, %v174_v3  ;;  %399 = vmatmul.msk.f32.vlgmr.msra.gmra.mxu3 %vm181_vm0, %v177_v4  ;;  %v173_v8 = vld [vmem:[%s165_s21 + $0x10] sm:$0xff]  ;;  %v176_v9 = vld [vmem:[%s165_s21 + $0x28] sm:$0xff] }
  0x17   : > { %394 = vmatmul.msk.f32.gmra.mxu0 %vm181_vm0, %v172_v5 }
  0x18   : > { %397 = vmatmul.msk.f32.gmra.mxu2 %vm181_vm0, %v175_v6  ;;  %400 = vmatmul.msk.f32.gmra.mxu3 %vm181_vm0, %v178_v7 }
  0x1f   : > { %395 = vmatmul.msk.f32.gmra.mxu0 %vm181_vm0, %v173_v8 }
  0x20   : > { %398 = vmatmul.msk.f32.gmra.mxu2 %vm181_vm0, %v176_v9 }
  0x8c   : > { %v223_v10 = vpop.f32.mrf.mxu0 }
  0x93   : > { %v232_v11 = vpop.f32.mrf.mxu2  ;;  %v241_v12 = vpop.f32.mrf.mxu3 }
  0x94   : > { %v226_v13 = vpop.f32.mrf.mxu0 }
  0x9b   : > { %v235_v14 = vpop.f32.mrf.mxu2  ;;  %v244_v15 = vpop.f32.mrf.mxu3 }
  0x9c   : > { %v229_v16 = vpop.f32.mrf.mxu0  ;;  %v436_v17 = vpack.i.bf16 %v241_v12, %v244_v15 }
  0x9d   : > { %v426_v18 = vpack.i.bf16 %v229_v16, %v232_v11 }
  0x9e   : > { %437 = vrot.lane.b32.xlu1 %v436_v17, %s449_s22 }
  0x9f   : > { %427 = vrot.lane.b32.xlu0 %v426_v18, %s450_s23 }
  0xa3   : > { %v238_v19 = vpop.f32.mrf.mxu2 }
  0xa4   : > { %v431_v20 = vpack.i.bf16 %v235_v14, %v238_v19 }
  0xa7   : > { %432 = vrot.lane.b32.xlu0 %v431_v20, %s451_s24 }
 0x110   : > { %v438_v24 = vpop.permute.xlu1 %437 }
 0x111   : > { %v428_v21 = vpop.permute.xlu0 %427  ;;  %v439_v28 = vunpack.i.l.bf16 %v438_v24  ;;  %v440_v33 = vunpack.i.h.bf16 %v438_v24 }
 0x112   : > { %v430_v22 = vunpack.i.h.bf16 %v428_v21  ;;  %v429_v23 = vunpack.i.l.bf16 %v428_v21 }
 0x114   : > { %v273_v29 = vsel %vm271_vm1, %v226_v13, %v429_v23  ;;  %v272_v30 = vsel %vm271_vm1, %v223_v10, %v430_v22 }
 0x119   : > { %v433_v25 = vpop.permute.xlu0 %432 }
 0x11a   : > { %v435_v26 = vunpack.i.h.bf16 %v433_v25  ;;  %v434_v27 = vunpack.i.l.bf16 %v433_v25 }
 0x11c   : > { %v276_v31 = vsel %vm274_vm2, %v273_v29, %v434_v27  ;;  %v275_v32 = vsel %vm274_vm2, %v272_v30, %v435_v26 }
 0x11d   : > { %v279_v34 = vsel %vm277_vm3, %v276_v31, %v439_v28  ;;  %v278_v37 = vsel %vm277_vm3, %v275_v32, %v440_v33 }
 0x11e   : > { %310 = vmatpush.msra.mxu1 %v279_v34  ;;  %413 = vmatpush.msrb.mxu3 %v279_v34 }
 0x120   : > { %311 = vmatpush.msra.mxu1 %v278_v37  ;;  %414 = vmatpush.msrb.mxu3 %v278_v37 }
 0x121   : > { %401 = vmatmul.msk.f32.vlgmr.msra.gmra.mxu1 %vm181_vm0, %v280_v35  ;;  %404 = vmatmul.msk.f32.vlgmr.msrb.gmra.mxu3 %vm181_vm0, %v283_v36 }
 0x129   : > { %402 = vmatmul.msk.f32.gmra.mxu1 %vm181_vm0, %v281_v38 }
 0x131   : > { %403 = vmatmul.msk.f32.gmra.mxu1 %vm181_vm0, %v282_v39 }
 0x19e   : > { %v313_v40 = vpop.f32.mrf.mxu1 }
 0x19f   : > { %325 = vst [vmem:[%s170_s9] sm:$0xff] %v313_v40 }
 0x1a4   : > { %v322_v41 = vpop.f32.mrf.mxu3 }
 0x1a5   : > { %328 = vst [vmem:[%s170_s9 + $0x18] sm:$0xff] %v322_v41 }
 0x1a6   : > { %v316_v42 = vpop.f32.mrf.mxu1 }
 0x1a7   : > { %326 = vst [vmem:[%s170_s9 + $0x8] sm:$0xff] %v316_v42 }
 0x1ae   : > { %v319_v43 = vpop.f32.mrf.mxu1 }
 0x1af   : > { %327 = vst [vmem:[%s170_s9 + $0x10] sm:$0xff] %v319_v43 }
 0x1b0 PF: > { %s13_s12 = sadd.s32 1, %s447_s12  }
 0x1b1   : > { %p10_p4 = scmp.ge.s32.totalorder %s13_s12, 4  }
 0x1b3   :  { %12 = sbr.rel (!%p10_p4) target bundleno = 1 (0x1), region = 62 }

</bundles_post_ra>
